<compile_context>
chip_gen: v7x
topology: tpu7x:2x2x1
jax: 0.10.0
libtpu: 0.0.40
codegen_flags: <defaults>
</compile_context>

<pallas_src>
import jax
import jax.numpy as jnp
from jax.experimental import pallas as pl
from jax.experimental.pallas import tpu as pltpu

D_IN = 784
DIMS = [784, 128, 64, 16, 64, 128, 784]


def _autoencoder_kernel(x_ref,
                        w1, b1, w2, b2, w34, b34, w5, b5, w6, b6,
                        o_ref):
    """Fused 5-matmul autoencoder forward for one batch tile.

    x_ref: (tile, 784). Weights (in, out) bf16. Biases (1, out) f32.
    All matmuls accumulate in f32 on the MXU; bias-add/ReLU run in f32.
    Output is stored in bf16 (lane-ragged 784 store; cheaper than padding).
    """
    x = x_ref[...].astype(jnp.bfloat16)                     # cast in-kernel

    h = jnp.dot(x, w1[...], preferred_element_type=jnp.float32) + b1[...]
    h = jnp.maximum(h, 0.0)

    h = jnp.dot(h.astype(jnp.bfloat16), w2[...],
                preferred_element_type=jnp.float32) + b2[...]
    h = jnp.maximum(h, 0.0)

    # Fused bottleneck: (64->16) then (16->64) with no activation in between,
    # replaced by a single 64x64 matmul (W34 = W3 @ W4, b34 = b3 @ W4 + b4).
    h = jnp.dot(h.astype(jnp.bfloat16), w34[...],
                preferred_element_type=jnp.float32) + b34[...]
    h = jnp.maximum(h, 0.0)

    h = jnp.dot(h.astype(jnp.bfloat16), w5[...],
                preferred_element_type=jnp.float32) + b5[...]
    h = jnp.maximum(h, 0.0)

    h = jnp.dot(h.astype(jnp.bfloat16), w6[...],
                preferred_element_type=jnp.float32) + b6[...]
    # no activation after the final decoder layer

    o_ref[...] = h.astype(jnp.bfloat16)                     # bf16 output


def prepare_params(params):
    """params: list of (W_t (in,out) f32, b (1,out) f32) for the 6 layers.

    Returns the flat kernel operand list: bottleneck-fused, weights cast to
    bf16 (MXU operands), biases kept f32 (epilogue). No feature padding.
    """
    (w1, b1), (w2, b2), (w3, b3), (w4, b4), (w5, b5), (w6, b6) = params

    # Algebraic fusion of the activation-free 64->16->64 pair (exact in f32).
    w34 = w3 @ w4                      # (64, 64)
    b34 = b3 @ w4 + b4                 # (1, 64)

    weights = [w1, w2, w34, w5, w6]
    biases = [b1, b2, b34, b5, b6]

    flat = []
    for w, b in zip(weights, biases):
        flat.append(w.astype(jnp.bfloat16))      # MXU operands in bf16
        flat.append(b.astype(jnp.float32))       # epilogue in f32
    return flat


def _choose_batch_tile(B):
    """Pick a row tile: full block for small batches; 256-512 rows otherwise
    (amortizes per-step overhead, keeps >=2 grid steps for v7x's two TCs)."""
    if B <= 512:
        return B                       # single block; block dim == array dim
    if B <= 2048:
        return 256                     # >= 2 steps -> both v7x TCs get work
    return 512                         # ~85% of HBM roofline per v6e sweep


def autoencoder_forward(x, flat_params, *, batch_tile=None):
    """x: (B, 784) f32 (or bf16). flat_params: output of prepare_params().

    Returns (B, 784) bf16 reconstruction.
    """
    B, F = x.shape
    assert F == D_IN

    bt = _choose_batch_tile(B) if batch_tile is None else batch_tile
    grid = (pl.cdiv(B, bt),)           # ragged last block handled by Pallas

    def full_spec(arr):
        return pl.BlockSpec(arr.shape, lambda i: (0,) * arr.ndim)

    in_specs = [pl.BlockSpec((bt, D_IN), lambda i: (i, 0))]
    in_specs += [full_spec(p) for p in flat_params]
    out_spec = pl.BlockSpec((bt, D_IN), lambda i: (i, 0))

    out = pl.pallas_call(
        _autoencoder_kernel,
        out_shape=jax.ShapeDtypeStruct((B, D_IN), jnp.bfloat16),
        grid_spec=pltpu.PrefetchScalarGridSpec(
            num_scalar_prefetch=0,
            grid=grid,
            in_specs=in_specs,
            out_specs=out_spec,
        ),
        compiler_params=pltpu.CompilerParams(
            dimension_semantics=("parallel",),
            vmem_limit_bytes=32 * 1024 * 1024,
        ),
    )(x, *flat_params)

    return out


def init_params(key):
    """Deterministic PyTorch-style init: U(-1/sqrt(fan_in), 1/sqrt(fan_in)),
    stored pre-transposed as (in, out) with (1, out) bias rows."""
    params = []
    for li in range(len(DIMS) - 1):
        fan_in, fan_out = DIMS[li], DIMS[li + 1]
        key, kw, kb = jax.random.split(key, 3)
        bound = 1.0 / jnp.sqrt(fan_in)
        w_t = jax.random.uniform(kw, (fan_in, fan_out), jnp.float32, -bound, bound)
        b = jax.random.uniform(kb, (1, fan_out), jnp.float32, -bound, bound)
        params.append((w_t, b))
    return params


def reference_forward(x, params):
    """Pure-JAX f32 reference of the original module's forward pass."""
    h = x
    relu_after = [True, True, False, True, True, False]
    for (w, b), act in zip(params, relu_after):
        h = h @ w + b
        if act:
            h = jnp.maximum(h, 0.0)
    return h


if __name__ == "__main__":
    key = jax.random.PRNGKey(0)
    kp, kx = jax.random.split(key)

    params = init_params(kp)
    flat_params = prepare_params(params)

    B = 8
    x = jax.random.normal(kx, (B, D_IN), jnp.float32)

    out = autoencoder_forward(x, flat_params)
    out = jax.block_until_ready(out)

    ref = reference_forward(x, params)
    assert out.shape == (B, D_IN)
    assert out.dtype == jnp.bfloat16
    # bf16 MXU operands / bf16 output with f32 accumulation: compare against
    # the f32 reference with a bf16-appropriate tolerance.
    assert jnp.allclose(out.astype(jnp.float32), ref, atol=3e-2, rtol=3e-2), \
        "mismatch vs reference"

    print("KERNEL_OK")
</pallas_src>

<mosaic_0001>
module attributes {stable_mosaic.version = 11 : i64} {
  func.func @_autoencoder_kernel(%arg0: i32, %arg1: memref<8x784xf32, #tpu.memory_space<vmem>>, %arg2: memref<784x128xbf16, #tpu.memory_space<vmem>>, %arg3: memref<1x128xf32, #tpu.memory_space<vmem>>, %arg4: memref<128x64xbf16, #tpu.memory_space<vmem>>, %arg5: memref<1x64xf32, #tpu.memory_space<vmem>>, %arg6: memref<64x64xbf16, #tpu.memory_space<vmem>>, %arg7: memref<1x64xf32, #tpu.memory_space<vmem>>, %arg8: memref<64x128xbf16, #tpu.memory_space<vmem>>, %arg9: memref<1x128xf32, #tpu.memory_space<vmem>>, %arg10: memref<128x784xbf16, #tpu.memory_space<vmem>>, %arg11: memref<1x784xf32, #tpu.memory_space<vmem>>, %arg12: memref<8x784xbf16, #tpu.memory_space<vmem>>) attributes {dimension_semantics = [#tpu.dimension_semantics<parallel>], iteration_bounds = array<i64: 1>, scalar_prefetch = 0 : i64, scratch_operands = 0 : i64, tpu.core_type = #tpu.core_type<tc>, window_params = [{transform_indices = @transform_0, window_bounds = array<i64: 8, 784>}, {pipeline_mode = #tpu.pipeline_mode<synchronous>, transform_indices = @transform_1, window_bounds = array<i64: 784, 128>}, {pipeline_mode = #tpu.pipeline_mode<synchronous>, transform_indices = @transform_2, window_bounds = array<i64: 1, 128>}, {pipeline_mode = #tpu.pipeline_mode<synchronous>, transform_indices = @transform_3, window_bounds = array<i64: 128, 64>}, {pipeline_mode = #tpu.pipeline_mode<synchronous>, transform_indices = @transform_4, window_bounds = array<i64: 1, 64>}, {pipeline_mode = #tpu.pipeline_mode<synchronous>, transform_indices = @transform_5, window_bounds = array<i64: 64, 64>}, {pipeline_mode = #tpu.pipeline_mode<synchronous>, transform_indices = @transform_6, window_bounds = array<i64: 1, 64>}, {pipeline_mode = #tpu.pipeline_mode<synchronous>, transform_indices = @transform_7, window_bounds = array<i64: 64, 128>}, {pipeline_mode = #tpu.pipeline_mode<synchronous>, transform_indices = @transform_8, window_bounds = array<i64: 1, 128>}, {pipeline_mode = #tpu.pipeline_mode<synchronous>, transform_indices = @transform_9, window_bounds = array<i64: 128, 784>}, {pipeline_mode = #tpu.pipeline_mode<synchronous>, transform_indices = @transform_10, window_bounds = array<i64: 1, 784>}, {transform_indices = @transform_11, window_bounds = array<i64: 8, 784>}]} {
    %c0 = arith.constant 0 : index
    %c0_0 = arith.constant 0 : index
    %0 = vector.load %arg1[%c0, %c0_0] : memref<8x784xf32, #tpu.memory_space<vmem>>, vector<8x784xf32>
    %1 = arith.truncf %0 : vector<8x784xf32> to vector<8x784xbf16>
    %c0_1 = arith.constant 0 : index
    %c0_2 = arith.constant 0 : index
    %2 = vector.load %arg2[%c0_1, %c0_2] : memref<784x128xbf16, #tpu.memory_space<vmem>>, vector<784x128xbf16>
    %cst = arith.constant dense<0.000000e+00> : vector<8x128xf32>
    %3 = tpu.matmul %1, %2, %cst {dimension_numbers = #tpu.dot_dimension_numbers<[1], [0], [0], [1], [0, 0, 1, 1], [], []>} : vector<8x784xbf16>, vector<784x128xbf16>, vector<8x128xf32> -> vector<8x128xf32>
    %c0_3 = arith.constant 0 : index
    %c0_4 = arith.constant 0 : index
    %4 = vector.load %arg3[%c0_3, %c0_4] : memref<1x128xf32, #tpu.memory_space<vmem>>, vector<1x128xf32>
    %5 = vector.broadcast %4 : vector<1x128xf32> to vector<8x128xf32>
    %6 = arith.addf %3, %5 : vector<8x128xf32>
    %cst_5 = arith.constant 0.000000e+00 : f32
    %7 = vector.broadcast %cst_5 : f32 to vector<8x128xf32>
    %8 = arith.maximumf %6, %7 : vector<8x128xf32>
    %9 = arith.truncf %8 : vector<8x128xf32> to vector<8x128xbf16>
    %c0_6 = arith.constant 0 : index
    %c0_7 = arith.constant 0 : index
    %10 = vector.load %arg4[%c0_6, %c0_7] : memref<128x64xbf16, #tpu.memory_space<vmem>>, vector<128x64xbf16>
    %cst_8 = arith.constant dense<0.000000e+00> : vector<8x64xf32>
    %11 = tpu.matmul %9, %10, %cst_8 {dimension_numbers = #tpu.dot_dimension_numbers<[1], [0], [0], [1], [0, 0, 1, 1], [], []>} : vector<8x128xbf16>, vector<128x64xbf16>, vector<8x64xf32> -> vector<8x64xf32>
    %c0_9 = arith.constant 0 : index
    %c0_10 = arith.constant 0 : index
    %12 = vector.load %arg5[%c0_9, %c0_10] : memref<1x64xf32, #tpu.memory_space<vmem>>, vector<1x64xf32>
    %13 = vector.broadcast %12 : vector<1x64xf32> to vector<8x64xf32>
    %14 = arith.addf %11, %13 : vector<8x64xf32>
    %cst_11 = arith.constant 0.000000e+00 : f32
    %15 = vector.broadcast %cst_11 : f32 to vector<8x64xf32>
    %16 = arith.maximumf %14, %15 : vector<8x64xf32>
    %17 = arith.truncf %16 : vector<8x64xf32> to vector<8x64xbf16>
    %c0_12 = arith.constant 0 : index
    %c0_13 = arith.constant 0 : index
    %18 = vector.load %arg6[%c0_12, %c0_13] : memref<64x64xbf16, #tpu.memory_space<vmem>>, vector<64x64xbf16>
    %cst_14 = arith.constant dense<0.000000e+00> : vector<8x64xf32>
    %19 = tpu.matmul %17, %18, %cst_14 {dimension_numbers = #tpu.dot_dimension_numbers<[1], [0], [0], [1], [0, 0, 1, 1], [], []>} : vector<8x64xbf16>, vector<64x64xbf16>, vector<8x64xf32> -> vector<8x64xf32>
    %c0_15 = arith.constant 0 : index
    %c0_16 = arith.constant 0 : index
    %20 = vector.load %arg7[%c0_15, %c0_16] : memref<1x64xf32, #tpu.memory_space<vmem>>, vector<1x64xf32>
    %21 = vector.broadcast %20 : vector<1x64xf32> to vector<8x64xf32>
    %22 = arith.addf %19, %21 : vector<8x64xf32>
    %cst_17 = arith.constant 0.000000e+00 : f32
    %23 = vector.broadcast %cst_17 : f32 to vector<8x64xf32>
    %24 = arith.maximumf %22, %23 : vector<8x64xf32>
    %25 = arith.truncf %24 : vector<8x64xf32> to vector<8x64xbf16>
    %c0_18 = arith.constant 0 : index
    %c0_19 = arith.constant 0 : index
    %26 = vector.load %arg8[%c0_18, %c0_19] : memref<64x128xbf16, #tpu.memory_space<vmem>>, vector<64x128xbf16>
    %cst_20 = arith.constant dense<0.000000e+00> : vector<8x128xf32>
    %27 = tpu.matmul %25, %26, %cst_20 {dimension_numbers = #tpu.dot_dimension_numbers<[1], [0], [0], [1], [0, 0, 1, 1], [], []>} : vector<8x64xbf16>, vector<64x128xbf16>, vector<8x128xf32> -> vector<8x128xf32>
    %c0_21 = arith.constant 0 : index
    %c0_22 = arith.constant 0 : index
    %28 = vector.load %arg9[%c0_21, %c0_22] : memref<1x128xf32, #tpu.memory_space<vmem>>, vector<1x128xf32>
    %29 = vector.broadcast %28 : vector<1x128xf32> to vector<8x128xf32>
    %30 = arith.addf %27, %29 : vector<8x128xf32>
    %cst_23 = arith.constant 0.000000e+00 : f32
    %31 = vector.broadcast %cst_23 : f32 to vector<8x128xf32>
    %32 = arith.maximumf %30, %31 : vector<8x128xf32>
    %33 = arith.truncf %32 : vector<8x128xf32> to vector<8x128xbf16>
    %c0_24 = arith.constant 0 : index
    %c0_25 = arith.constant 0 : index
    %34 = vector.load %arg10[%c0_24, %c0_25] : memref<128x784xbf16, #tpu.memory_space<vmem>>, vector<128x784xbf16>
    %cst_26 = arith.constant dense<0.000000e+00> : vector<8x784xf32>
    %35 = tpu.matmul %33, %34, %cst_26 {dimension_numbers = #tpu.dot_dimension_numbers<[1], [0], [0], [1], [0, 0, 1, 1], [], []>} : vector<8x128xbf16>, vector<128x784xbf16>, vector<8x784xf32> -> vector<8x784xf32>
    %c0_27 = arith.constant 0 : index
    %c0_28 = arith.constant 0 : index
    %36 = vector.load %arg11[%c0_27, %c0_28] : memref<1x784xf32, #tpu.memory_space<vmem>>, vector<1x784xf32>
    %37 = vector.broadcast %36 : vector<1x784xf32> to vector<8x784xf32>
    %38 = arith.addf %35, %37 : vector<8x784xf32>
    %39 = arith.truncf %38 : vector<8x784xf32> to vector<8x784xbf16>
    %c0_29 = arith.constant 0 : index
    %c0_30 = arith.constant 0 : index
    %40 = vector.load %arg12[%c0_29, %c0_30] : memref<8x784xbf16, #tpu.memory_space<vmem>>, vector<8x784xbf16>
    tpu.vector_store %arg12[%c0_29, %c0_30], %39 {strides = array<i32>} : memref<8x784xbf16, #tpu.memory_space<vmem>>, vector<8x784xbf16>,
    return
  }
  func.func @transform_0(%arg0: i32) -> (i32, i32) {
    %c0_i32 = arith.constant 0 : i32
    %c0_i32_0 = arith.constant 0 : i32
    return %arg0, %c0_i32 : i32, i32
  }
  func.func @transform_1(%arg0: i32) -> (i32, i32) {
    %c0_i32 = arith.constant 0 : i32
    %c0_i32_0 = arith.constant 0 : i32
    %c0_i32_1 = arith.constant 0 : i32
    return %c0_i32, %c0_i32_0 : i32, i32
  }
  func.func @transform_2(%arg0: i32) -> (i32, i32) {
    %c0_i32 = arith.constant 0 : i32
    %c0_i32_0 = arith.constant 0 : i32
    %c0_i32_1 = arith.constant 0 : i32
    return %c0_i32, %c0_i32_0 : i32, i32
  }
  func.func @transform_3(%arg0: i32) -> (i32, i32) {
    %c0_i32 = arith.constant 0 : i32
    %c0_i32_0 = arith.constant 0 : i32
    %c0_i32_1 = arith.constant 0 : i32
    return %c0_i32, %c0_i32_0 : i32, i32
  }
  func.func @transform_4(%arg0: i32) -> (i32, i32) {
    %c0_i32 = arith.constant 0 : i32
    %c0_i32_0 = arith.constant 0 : i32
    %c0_i32_1 = arith.constant 0 : i32
    return %c0_i32, %c0_i32_0 : i32, i32
  }
  func.func @transform_5(%arg0: i32) -> (i32, i32) {
    %c0_i32 = arith.constant 0 : i32
    %c0_i32_0 = arith.constant 0 : i32
    %c0_i32_1 = arith.constant 0 : i32
    return %c0_i32, %c0_i32_0 : i32, i32
  }
  func.func @transform_6(%arg0: i32) -> (i32, i32) {
    %c0_i32 = arith.constant 0 : i32
    %c0_i32_0 = arith.constant 0 : i32
    %c0_i32_1 = arith.constant 0 : i32
    return %c0_i32, %c0_i32_0 : i32, i32
  }
  func.func @transform_7(%arg0: i32) -> (i32, i32) {
    %c0_i32 = arith.constant 0 : i32
    %c0_i32_0 = arith.constant 0 : i32
    %c0_i32_1 = arith.constant 0 : i32
    return %c0_i32, %c0_i32_0 : i32, i32
  }
  func.func @transform_8(%arg0: i32) -> (i32, i32) {
    %c0_i32 = arith.constant 0 : i32
    %c0_i32_0 = arith.constant 0 : i32
    %c0_i32_1 = arith.constant 0 : i32
    return %c0_i32, %c0_i32_0 : i32, i32
  }
  func.func @transform_9(%arg0: i32) -> (i32, i32) {
    %c0_i32 = arith.constant 0 : i32
    %c0_i32_0 = arith.constant 0 : i32
    %c0_i32_1 = arith.constant 0 : i32
    return %c0_i32, %c0_i32_0 : i32, i32
  }
  func.func @transform_10(%arg0: i32) -> (i32, i32) {
    %c0_i32 = arith.constant 0 : i32
    %c0_i32_0 = arith.constant 0 : i32
    %c0_i32_1 = arith.constant 0 : i32
    return %c0_i32, %c0_i32_0 : i32, i32
  }
  func.func @transform_11(%arg0: i32) -> (i32, i32) {
    %c0_i32 = arith.constant 0 : i32
    %c0_i32_0 = arith.constant 0 : i32
    return %arg0, %c0_i32 : i32, i32
  }
}

</mosaic_0001>

<bundles_post_ra>
// kernel: tpu_custom_call.1
= control target key start
LH: loop header
LB: loop body
LE: loop exit
PB: predicated region body
PF: predicated region fallthrough
CT: control target
= control target key end

     0   :  { %v1976_v44 = vmov 0.0   ;;  %vm1977_vm0 = vmmov 0   ;;  %vm453_vm1 = vcmask 130048   ;;  %s2488_s0 = inlined_call_operand.vmem [shape: f32[8,784], index: 0, kind: input, shape index: {}]   ;;  %s2489_s1 = inlined_call_operand.vmem [shape: bf16[784,128], index: 1, kind: input, shape index: {}]   ;;  %s2490_s2 = inlined_call_operand.vmem [shape: f32[1,128], index: 2, kind: input, shape index: {}]   ;;  %s2491_s3 = inlined_call_operand.vmem [shape: bf16[128,64], index: 3, kind: input, shape index: {}]   ;;  %s2492_s4 = inlined_call_operand.vmem [shape: f32[1,64], index: 4, kind: input, shape index: {}]   ;;  %s2493_s5 = inlined_call_operand.vmem [shape: bf16[64,64], index: 5, kind: input, shape index: {}]   ;;  %s2494_s6 = inlined_call_operand.vmem [shape: f32[1,64], index: 6, kind: input, shape index: {}]   ;;  %s2495_s7 = inlined_call_operand.vmem [shape: bf16[64,128], index: 7, kind: input, shape index: {}]   ;;  %s2496_s8 = inlined_call_operand.vmem [shape: f32[1,128], index: 8, kind: input, shape index: {}]   ;;  %s2497_s9 = inlined_call_operand.vmem [shape: bf16[128,784], index: 9, kind: input, shape index: {}]   ;;  %s2498_s10 = inlined_call_operand.vmem [shape: f32[1,784], index: 10, kind: input, shape index: {}]   ;;  %s2499_s11 = inlined_call_operand.hbm [shape: bf16[8,784], index: 11, kind: output, shape index: {}]  }
   0x1   :  { %v1807_v0 = vld [vmem:[%s2489_s1 + $0x40] sm:$0xff]   ;;  %v1811_v4 = vld [vmem:[%s2489_s1 + $0x48] sm:$0xff]   ;;  %v1815_v8 = vld [vmem:[%s2489_s1 + $0x50] sm:$0xff]  }
   0x2   :  { %v1808_v1 = vld [vmem:[%s2489_s1] sm:$0xff]   ;;  %1637 = vmatprep.subr.bf16.mxu0 %v1807_v0  ;;  %v1812_v5 = vld [vmem:[%s2489_s1 + $0x8] sm:$0xff]   ;;  %v1816_v9 = vld [vmem:[%s2489_s1 + $0x10] sm:$0xff]  }
   0x3   :  { %v1809_v2 = vld [vmem:[%s2489_s1 + $0xc0] sm:$0xff]   ;;  %1638 = vmatpush3.bf16.msra.mxu0 %v1808_v1  ;;  %v1813_v6 = vld [vmem:[%s2489_s1 + $0xc8] sm:$0xff]   ;;  %v1817_v10 = vld [vmem:[%s2489_s1 + $0xd0] sm:$0xff]  }
   0x4   :  { %v1810_v3 = vld [vmem:[%s2489_s1 + $0x80] sm:$0xff]   ;;  %1659 = vmatprep.subr.bf16.mxu1 %v1809_v2  ;;  %1639 = vmatprep.subr.bf16.mxu0 %v1811_v4  ;;  %v1814_v7 = vld [vmem:[%s2489_s1 + $0x88] sm:$0xff]   ;;  %v1818_v11 = vld [vmem:[%s2489_s1 + $0x90] sm:$0xff]  }
   0x5   :  { %1660 = vmatpush3.bf16.msra.mxu1 %v1810_v3  ;;  %v1819_v12 = vld [vmem:[%s2489_s1 + $0x58] sm:$0xff]   ;;  %v1823_v16 = vld [vmem:[%s2489_s1 + $0x60] sm:$0xff]   ;;  %v1827_v20 = vld [vmem:[%s2489_s1 + $0x68] sm:$0xff]  }
   0x6   :  { %1661 = vmatprep.subr.bf16.mxu1 %v1813_v6  ;;  %v1820_v13 = vld [vmem:[%s2489_s1 + $0x18] sm:$0xff]   ;;  %v1824_v17 = vld [vmem:[%s2489_s1 + $0x20] sm:$0xff]   ;;  %v1828_v21 = vld [vmem:[%s2489_s1 + $0x28] sm:$0xff]  }
   0x7   :  { %1640 = vmatpush3.bf16.msra.mxu0 %v1812_v5  ;;  %v1821_v14 = vld [vmem:[%s2489_s1 + $0xd8] sm:$0xff]   ;;  %v1825_v18 = vld [vmem:[%s2489_s1 + $0xe0] sm:$0xff]   ;;  %v1829_v22 = vld [vmem:[%s2489_s1 + $0xe8] sm:$0xff]  }
   0x8   :  { %1641 = vmatprep.subr.bf16.mxu0 %v1815_v8  ;;  %v1822_v15 = vld [vmem:[%s2489_s1 + $0x98] sm:$0xff]   ;;  %v1826_v19 = vld [vmem:[%s2489_s1 + $0xa0] sm:$0xff]   ;;  %v1830_v23 = vld [vmem:[%s2489_s1 + $0xa8] sm:$0xff]  }
   0x9   :  { %1662 = vmatpush3.bf16.msra.mxu1 %v1814_v7  ;;  %v1831_v24 = vld [vmem:[%s2489_s1 + $0x70] sm:$0xff]   ;;  %v1835_v28 = vld [vmem:[%s2489_s1 + $0x78] sm:$0xff]   ;;  %v41_v31 = vld [vmem:[%s2488_s0 + $0x8] sm:$0xff] }
   0xa   :  { %1663 = vmatprep.subr.bf16.mxu1 %v1817_v10  ;;  %v1832_v25 = vld [vmem:[%s2489_s1 + $0x30] sm:$0xff]   ;;  %v1836_v29 = vld [vmem:[%s2489_s1 + $0x38] sm:$0xff]   ;;  %v48_v32 = vpack.c.bf16 %v41_v31, %v41_v31  ;;  %v40_v34 = vld [vmem:[%s2488_s0] sm:$0xff] }
   0xb   :  { %1642 = vmatpush3.bf16.msra.mxu0 %v1816_v9  ;;  %v1833_v26 = vld [vmem:[%s2489_s1 + $0xf0] sm:$0xff]   ;;  %v1837_v30 = vld [vmem:[%s2489_s1 + $0xf8] sm:$0xff]   ;;  %v47_v35 = vpack.c.bf16 %v40_v34, %v40_v34  ;;  %v1839_v36 = vld [vmem:[%s2489_s1 + $0x140] sm:$0xff]  }
   0xc   :  { %1643 = vmatprep.subr.bf16.mxu0 %v1819_v12  ;;  %v1834_v27 = vld [vmem:[%s2489_s1 + $0xb0] sm:$0xff]   ;;  %v1838_v33 = vld [vmem:[%s2489_s1 + $0xb8] sm:$0xff]   ;;  %489 = vmatprep.mubr.bf16.mxu0 %v48_v32  ;;  %v1840_v39 = vld [vmem:[%s2489_s1 + $0x100] sm:$0xff]  }
   0xd   :  { %1664 = vmatpush3.bf16.msra.mxu1 %v1818_v11  ;;  %v43_v37 = vld [vmem:[%s2488_s0 + $0x18] sm:$0xff]  ;;  %v42_v40 = vld [vmem:[%s2488_s0 + $0x10] sm:$0xff]  ;;  %v1841_v42 = vld [vmem:[%s2489_s1 + $0x148] sm:$0xff]  }
   0xe   :  { %1665 = vmatprep.subr.bf16.mxu1 %v1821_v14  ;;  %v50_v38 = vpack.c.bf16 %v43_v37, %v43_v37  ;;  %v49_v41 = vpack.c.bf16 %v42_v40, %v42_v40  ;;  %v1842_v43 = vld [vmem:[%s2489_s1 + $0x108] sm:$0xff]   ;;  %v1843_v45 = vld [vmem:[%s2489_s1 + $0x150] sm:$0xff]   ;;  %v1845_v47 = vld [vmem:[%s2489_s1 + $0x158] sm:$0xff]  }
   0xf   :  { %1644 = vmatpush3.bf16.msra.mxu0 %v1820_v13  ;;  %v1844_v46 = vld [vmem:[%s2489_s1 + $0x110] sm:$0xff]   ;;  %v1846_v48 = vld [vmem:[%s2489_s1 + $0x118] sm:$0xff]   ;;  %v1847_v49 = vld [vmem:[%s2489_s1 + $0x160] sm:$0xff]  }
  0x10   :  { %1645 = vmatprep.subr.bf16.mxu0 %v1823_v16  ;;  %529 = vmatprep.mubr.bf16.mxu1 %v50_v38  ;;  %v1848_v50 = vld [vmem:[%s2489_s1 + $0x120] sm:$0xff]   ;;  %v1849_v51 = vld [vmem:[%s2489_s1 + $0x168] sm:$0xff]   ;;  %v1851_v55 = vld [vmem:[%s2489_s1 + $0x170] sm:$0xff]  }
  0x11   :  { %1666 = vmatpush3.bf16.msra.mxu1 %v1822_v15  ;;  %v1850_v52 = vld [vmem:[%s2489_s1 + $0x128] sm:$0xff]   ;;  %v1855_v53 = vld [vmem:[%s2489_s1 + $0x180] sm:$0xff]   ;;  %v46_v57 = vld [vmem:[%s2488_s0 + $0x30] sm:$0xff] }
  0x12   :  { %1667 = vmatprep.subr.bf16.mxu1 %v1825_v18  ;;  %v45_v54 = vld [vmem:[%s2488_s0 + $0x28] sm:$0xff]  ;;  %v53_v58 = vpack.c.bf16 %v46_v57, %v46_v57  ;;  %v1852_v59 = vld [vmem:[%s2489_s1 + $0x130] sm:$0xff]   ;;  %v1853_v60 = vld [vmem:[%s2489_s1 + $0x178] sm:$0xff]  }
  0x13   :  { %1646 = vmatpush3.bf16.msra.mxu0 %v1824_v17  ;;  %v52_v56 = vpack.c.bf16 %v45_v54, %v45_v54  ;;  %v1854_v61 = vld [vmem:[%s2489_s1 + $0x138] sm:$0xff]   ;;  %v44_v62 = vld [vmem:[%s2488_s0 + $0x20] sm:$0xff] }
  0x14   :  { %1647 = vmatprep.subr.bf16.mxu0 %v1827_v20  ;;  %v51_v63 = vpack.c.bf16 %v44_v62, %v44_v62 }
  0x15   :  { %1668 = vmatpush3.bf16.msra.mxu1 %v1826_v19 }
  0x16   :  { %1669 = vmatprep.subr.bf16.mxu1 %v1829_v22 }
  0x17   :  { %1648 = vmatpush3.bf16.msra.mxu0 %v1828_v21 }
  0x18   :  { %1649 = vmatprep.subr.bf16.mxu0 %v1831_v24 }
  0x19   :  { %1670 = vmatpush3.bf16.msra.mxu1 %v1830_v23 }
  0x1a   :  { %1671 = vmatprep.subr.bf16.mxu1 %v1833_v26 }
  0x1b   :  { %1650 = vmatpush3.bf16.msra.mxu0 %v1832_v25 }
  0x1c   :  { %1651 = vmatprep.subr.bf16.mxu0 %v1835_v28 }
  0x1d   :  { %1672 = vmatpush3.bf16.msra.mxu1 %v1834_v27 }
  0x1e   :  { %1673 = vmatprep.subr.bf16.mxu1 %v1837_v30 }
  0x1f   :  { %1652 = vmatpush3.bf16.msra.mxu0 %v1836_v29 }
  0x20   :  { %1681 = vmatprep.subr.bf16.mxu0 %v1839_v36 }
  0x21   :  { %1674 = vmatpush3.bf16.msra.mxu1 %v1838_v33 }
  0x22   :  { %490 = vmatmul.mubr.bf16.vlgmr.msra.gmra.mrb[0].mxu0 %v47_v35  ;;  %1733 = vmatprep.subr.bf16.mxu1 %v1976_v44 }
  0x23   :  { %1682 = vmatpush3.bf16.msra.mxu0 %v1840_v39  ;;  %569 = vmatprep.mubr.bf16.mxu0 %v52_v56 }
  0x24   :  { %530 = vmatmul.mubr.bf16.vlgmr.msra.gmra.mrb[0].mxu1 %v49_v41  ;;  %1683 = vmatprep.subr.bf16.mxu0 %v1841_v42 }
  0x25   :  { %1735 = vmatprep.mubr.msk.bf16.mxu1 %vm1977_vm0, %v1976_v44  ;;  %1734 = vmatpush3.bf16.msra.mxu1 %v1855_v53 }
  0x26   :  { %1739 = vmatprep.subr.bf16.mxu1 %v1976_v44 }
  0x27   :  { %1684 = vmatpush3.bf16.msra.mxu0 %v1842_v43 }
  0x28   :  { %1685 = vmatprep.subr.bf16.mxu0 %v1843_v45 }
  0x2b   :  { %1686 = vmatpush3.bf16.msra.mxu0 %v1844_v46 }
  0x2c   :  { %1687 = vmatprep.subr.bf16.mxu0 %v1845_v47  ;;  %1736 = vmatmul.mubr.msk.bf16.vlgmr.msra.gmra.mrb[4].mxu1 %vm453_vm1, %v53_v58 }
  0x2d   :  { %1755 = vmatprep.mubr.msk.bf16.mxu1 %vm1977_vm0, %v1976_v44 }
  0x2f   :  { %1688 = vmatpush3.bf16.msra.mxu0 %v1846_v48 }
  0x30   :  { %1689 = vmatprep.subr.bf16.mxu0 %v1847_v49 }
  0x33   :  { %1690 = vmatpush3.bf16.msra.mxu0 %v1848_v50 }
  0x34   :  { %1691 = vmatprep.subr.bf16.mxu0 %v1849_v51 }
  0x37   :  { %1692 = vmatpush3.bf16.msra.mxu0 %v1850_v52 }
  0x38   :  { %1693 = vmatprep.subr.bf16.mxu0 %v1851_v55 }
  0x3b   :  { %1694 = vmatpush3.bf16.msra.mxu0 %v1852_v59 }
  0x3c   :  { %1695 = vmatprep.subr.bf16.mxu0 %v1853_v60 }
  0x3f   :  { %1696 = vmatpush3.bf16.msra.mxu0 %v1854_v61 }
  0x40   :  { %1759 = vmatprep.subr.bf16.mxu0 %v1976_v44 }
  0x42   :  { %570 = vmatmul.mubr.bf16.vlgmr.msra.gmra.mrb[4].mxu0 %v51_v63 }
  0x43   :  { %1767 = vmatprep.mubr.msk.bf16.mxu0 %vm1977_vm0, %v1976_v44 }
  0x44   :  { %16 = vsyncpa [#allocation3], 0  ;;  %v1856_v0 = vld [vmem:[%s2491_s3] sm:$0xff]   ;;  %v1857_v1 = vld [vmem:[%s2491_s3 + $0x8] sm:$0xff]   ;;  %vm771_vm2 = vcmask 523264   ;;  %vm1485_vm3 = vcmask 125952  }
  0x45   :  { %1740 = vmatpush3.bf16.msra.mxu1 %v1856_v0  ;;  %v1858_v2 = vld [vmem:[%s2491_s3 + $0x10] sm:$0xff]   ;;  %v1859_v3 = vld [vmem:[%s2491_s3 + $0x18] sm:$0xff]   ;;  %v1860_v4 = vld [vmem:[%s2491_s3 + $0x20] sm:$0xff]  }
  0x46   :  { %1741 = vmatprep.subr.bf16.mxu1 %v1976_v44  ;;  %v1861_v5 = vld [vmem:[%s2491_s3 + $0x28] sm:$0xff]   ;;  %v1862_v6 = vld [vmem:[%s2491_s3 + $0x30] sm:$0xff]   ;;  %v1863_v7 = vld [vmem:[%s2491_s3 + $0x38] sm:$0xff]  }
  0x47   :  { %v1864_v8 = vld [vmem:[%s2493_s5] sm:$0xff]   ;;  %v1865_v9 = vld [vmem:[%s2493_s5 + $0x8] sm:$0xff]   ;;  %v1866_v36 = vld [vmem:[%s2493_s5 + $0x10] sm:$0xff]  }
  0x48   :  { %1760 = vmatpush3.bf16.msra.mxu0 %v1864_v8  ;;  %v1501_v11 = vld [vmem:[%s2490_s2] ss:$0 sm:$0xff]  ;;  %v1867_v37 = vld [vmem:[%s2493_s5 + $0x18] sm:$0xff]   ;;  %v1869_v39 = vld [vmem:[%s2495_s7 + $0x8] sm:$0xff]  }
  0x49   :  { %1742 = vmatpush3.bf16.msra.mxu1 %v1857_v1  ;;  %1761 = vmatprep.subr.bf16.mxu0 %v1976_v44  ;;  %v1868_v38 = vld [vmem:[%s2495_s7] sm:$0xff]   ;;  %v1870_v49 = vld [vmem:[%s2495_s7 + $0x10] sm:$0xff]   ;;  %v1871_v50 = vld [vmem:[%s2495_s7 + $0x18] sm:$0xff]  }
  0x4a   :  { %1743 = vmatprep.subr.bf16.mxu1 %v1976_v44  ;;  %v1552_v40 = vld [vmem:[%s2492_s4] ss:$0 sm:$0xff]  ;;  %v1877_v53 = vld [vmem:[%s2497_s9 + $0xc] ss:$28 sps:$4 sm:$0xff]   ;;  %v1880_v54 = vld [vmem:[%s2497_s9 + $0x3c] ss:$28 sps:$4 sm:$0xff]  }
  0x4b   :  { %v1872_v51 = vld [vmem:[%s2497_s9] ss:$28 sps:$4 sm:$0xff]   ;;  %v1878_v55 = vld [vmem:[%s2497_s9 + $0x38] ss:$28 sps:$4 sm:$0xff]   ;;  %v1884_v57 = vld [vmem:[%s2497_s9 + $0x70] ss:$28 sps:$4 sm:$0xff]  }
  0x4c   :  { %1762 = vmatpush3.bf16.msra.mxu0 %v1865_v9  ;;  %v1874_v52 = vld [vmem:[%s2497_s9 + $0x4] ss:$28 sps:$4 sm:$0xff]   ;;  %v1886_v56 = vld [vmem:[%s2497_s9 + $0x74] ss:$28 sps:$4 sm:$0xff]   ;;  %v1892_v58 = vld [vmem:[%s2497_s9 + $0xac] ss:$28 sps:$4 sm:$0xff]  }
  0x4d   :  { %1744 = vmatpush3.bf16.msra.mxu1 %v1858_v2  ;;  %1763 = vmatprep.subr.bf16.mxu0 %v1976_v44  ;;  %v1890_v59 = vld [vmem:[%s2497_s9 + $0xa8] ss:$28 sps:$4 sm:$0xff]   ;;  %v1896_v61 = vld [vmem:[%s2497_s9 + $0xe0] ss:$28 sps:$4 sm:$0xff]   ;;  %v1902_v63 = vld [vmem:[%s2497_s9 + $0x118] ss:$28 sps:$4 sm:$0xff]  }
  0x4e   :  { %1745 = vmatprep.subr.bf16.mxu1 %v1976_v44  ;;  %v1898_v60 = vld [vmem:[%s2497_s9 + $0xe4] ss:$28 sps:$4 sm:$0xff]   ;;  %v1904_v62 = vld [vmem:[%s2497_s9 + $0x11c] ss:$28 sps:$4 sm:$0xff]   ;;  %v1910_v0 = vld [vmem:[%s2497_s9 + $0x154] ss:$28 sps:$4 sm:$0xff]  }
  0x4f   :  { %v1908_v1 = vld [vmem:[%s2497_s9 + $0x150] ss:$28 sps:$4 sm:$0xff]   ;;  %v1561_v2 = vld [vmem:[%s2494_s6] ss:$0 sm:$0xff]  ;;  %v1875_v9 = vld [vmem:[%s2497_s9 + $0x8] ss:$28 sps:$4 sm:$0xff]  }
  0x50   :  { %1764 = vmatpush3.bf16.msra.mxu0 %v1866_v36  ;;  %v1920_v36 = vld [vmem:[%s2497_s9 + $0x10] ss:$28 sps:$4 sm:$0xff]  }
  0x51   :  { %1746 = vmatpush3.bf16.msra.mxu1 %v1859_v3  ;;  %1765 = vmatprep.subr.bf16.mxu0 %v1976_v44 }
  0x52   :  { %1747 = vmatprep.subr.bf16.mxu1 %v1976_v44 }
  0x54   :  { %1766 = vmatpush3.bf16.msra.mxu0 %v1867_v37  ;;  %v1923_v37 = vld [vmem:[%s2497_s9 + $0x18] ss:$28 sps:$4 sm:$0xff]  }
  0x55   :  { %1748 = vmatpush3.bf16.msra.mxu1 %v1860_v4  ;;  %1290 = vmatprep.subr.bf16.mxu0 %v1874_v52  ;;  %v1942_v52 = vld [vmem:[%s2497_s9 + $0x12c] ss:$28 sps:$4 sm:$0xff]  }
  0x56   :  { %1749 = vmatprep.subr.bf16.mxu1 %v1976_v44 }
  0x59   :  { %1750 = vmatpush3.bf16.msra.mxu1 %v1861_v5 }
  0x5a   :  { %1751 = vmatprep.subr.bf16.mxu1 %v1976_v44 }
  0x5d   :  { %1752 = vmatpush3.bf16.msra.mxu1 %v1862_v6 }
  0x5e   :  { %1753 = vmatprep.subr.bf16.mxu1 %v1976_v44 }
  0x61   :  { %1754 = vmatpush3.bf16.msra.mxu1 %v1863_v7 }
  0x62   :  { %1771 = vmatprep.subr.bf16.mxu1 %v1976_v44 }
  0xf5   :  { %v1653_v10 = vpop.f32.mrb[0].mxu0 }
  0xf6   :  { %v1654_v12 = vpop.f32.mrb[1].mxu0 }
  0xf7   :  { %v1655_v13 = vadd.f32 %v1654_v12, %v1653_v10  ;;  %v1656_v14 = vpop.f32.mrb[2].mxu0  ;;  %v1675_v15 = vpop.f32.mrb[0].mxu1  ;;  %v1881_v12 = vld [vmem:[%s2497_s9 + $0x40] ss:$28 sps:$4 sm:$0xff]  }
  0xf8   :  { %v1657_v16 = vpop.f32.mrb[3].mxu0  ;;  %v1676_v18 = vpop.f32.mrb[1].mxu1  ;;  %v1887_v14 = vld [vmem:[%s2497_s9 + $0x78] ss:$28 sps:$4 sm:$0xff]  }
  0xf9   :  { %v492_v17 = vadd.f32 %v1655_v13, %v1501_v11  ;;  %v1677_v19 = vadd.f32 %v1676_v18, %v1675_v15  ;;  %v1678_v20 = vpop.f32.mrb[2].mxu1  ;;  %v1883_v11 = vld [vmem:[%s2497_s9 + $0x44] ss:$28 sps:$4 sm:$0xff]   ;;  %v1889_v13 = vld [vmem:[%s2497_s9 + $0x7c] ss:$28 sps:$4 sm:$0xff]  }
  0xfa   :  { %v1679_v21 = vpop.f32.mrb[3].mxu1  ;;  %v1895_v15 = vld [vmem:[%s2497_s9 + $0xb4] ss:$28 sps:$4 sm:$0xff]   ;;  %v1899_v18 = vld [vmem:[%s2497_s9 + $0xe8] ss:$28 sps:$4 sm:$0xff]  }
  0xfb   :  { %v532_v22 = vadd.f32 %v1677_v19, %v492_v17  ;;  %v1893_v16 = vld [vmem:[%s2497_s9 + $0xb0] ss:$28 sps:$4 sm:$0xff]   ;;  %v1907_v19 = vld [vmem:[%s2497_s9 + $0x124] ss:$28 sps:$4 sm:$0xff]   ;;  %v1913_v21 = vld [vmem:[%s2497_s9 + $0x15c] ss:$28 sps:$4 sm:$0xff]  }
  0xfc   :  { %v1901_v17 = vld [vmem:[%s2497_s9 + $0xec] ss:$28 sps:$4 sm:$0xff]   ;;  %v1905_v20 = vld [vmem:[%s2497_s9 + $0x120] ss:$28 sps:$4 sm:$0xff]  }
  0xff   :  { %v611_v23 = vpop.f32.mrb[4].mxu1 }
 0x100   :  { %v1737_v24 = vpop.f32.mrb[5].mxu1 }
 0x101   :  { %v614_v25 = vpop.f32.mrb[6].mxu1  ;;  %v1919_v24 = vld [vmem:[%s2497_s9 + $0x194] ss:$28 sps:$4 sm:$0xff]  }
 0x102   :  { %v1738_v26 = vpop.f32.mrb[7].mxu1  ;;  %v1914_v25 = vld [vmem:[%s2497_s9 + $0x188] ss:$28 sps:$4 sm:$0xff]  }
 0x103   :  { %v1917_v26 = vld [vmem:[%s2497_s9 + $0x190] ss:$28 sps:$4 sm:$0xff]  }
 0x115   :  { %v1697_v27 = vpop.f32.mrb[4].mxu0 }
 0x116   :  { %v1698_v28 = vpop.f32.mrb[5].mxu0 }
 0x117   :  { %v1699_v29 = vadd.f32 %v1698_v28, %v1697_v27  ;;  %v1700_v30 = vpop.f32.mrb[6].mxu0  ;;  %v1922_v27 = vld [vmem:[%s2497_s9 + $0x14] ss:$28 sps:$4 sm:$0xff]   ;;  %v1978_v28 = vmov 0  }
 0x118   :  { %v1701_v31 = vpop.f32.mrb[7].mxu0 }
 0x119   :  { %v572_v32 = vadd.f32 %v1699_v29, %v532_v22  ;;  %v1911_v22 = vld [vmem:[%s2497_s9 + $0x158] ss:$28 sps:$4 sm:$0xff]   ;;  %v1567_v29 = vld [vmem:[%s2496_s8] ss:$0 sm:$0xff] }
 0x11b   :  { %v612_v33 = vadd.f32 %v611_v23, %v572_v32  ;;  %v1916_v23 = vld [vmem:[%s2497_s9 + $0x18c] ss:$28 sps:$4 sm:$0xff]  }
 0x11d   :  { %v617_v34 = vmax.f32 %v612_v33, 0.0 }
 0x11f   :  { %v618_v35 = vpack.c.bf16 %v617_v34, %v617_v34 }
 0x121   :  { %1756 = vmatmul.mubr.bf16.vlgmr.msra.gmra.mrb[8].mxu1 %v618_v35 }
 0x122   :  { %1779 = vmatprep.mubr.msk.bf16.mxu1 %vm1977_vm0, %v1976_v44  ;;  %1772 = vmatpush3.bf16.msra.mxu1 %v1868_v38 }
 0x123   :  { %1773 = vmatprep.subr.bf16.mxu1 %v1976_v44 }
 0x126   :  { %1774 = vmatpush3.bf16.msra.mxu1 %v1869_v39  ;;  %v1926_v39 = vld [vmem:[%s2497_s9 + $0x4c] ss:$28 sps:$4 sm:$0xff]  }
 0x127   :  { %1775 = vmatprep.subr.bf16.mxu1 %v1976_v44 }
 0x12a   :  { %1776 = vmatpush3.bf16.msra.mxu1 %v1870_v49  ;;  %v1938_v49 = vld [vmem:[%s2497_s9 + $0xf4] ss:$28 sps:$4 sm:$0xff]  }
 0x12b   :  { %1777 = vmatprep.subr.bf16.mxu1 %v1976_v44 }
 0x12e   :  { %1778 = vmatpush3.bf16.msra.mxu1 %v1871_v50  ;;  %v1936_v50 = vld [vmem:[%s2497_s9 + $0xf0] ss:$28 sps:$4 sm:$0xff]  }
 0x12f   :  { %1331 = vmatprep.subr.bf16.mxu1 %v1877_v53  ;;  %v1940_v53 = vld [vmem:[%s2497_s9 + $0x128] ss:$28 sps:$4 sm:$0xff]  }
 0x1f4   :  { %v724_v41 = vpop.f32.mrb[8].mxu1 }
 0x1f5   :  { %v725_v42 = vadd.f32 %v1552_v40, %v724_v41  ;;  %v1757_v43 = vpop.f32.mrb[9].mxu1  ;;  %v1924_v40 = vld [vmem:[%s2497_s9 + $0x48] ss:$28 sps:$4 sm:$0xff]   ;;  %v1927_v41 = vld [vmem:[%s2497_s9 + $0x50] ss:$28 sps:$4 sm:$0xff]  }
 0x1f6   :  { %v727_v45 = vpop.f32.mrb[10].mxu1  ;;  %v1928_v43 = vld [vmem:[%s2497_s9 + $0x80] ss:$28 sps:$4 sm:$0xff]  }
 0x1f7   :  { %v730_v46 = vmax.f32 %v725_v42, 0.0  ;;  %v1758_v47 = vpop.f32.mrb[11].mxu1  ;;  %v1930_v42 = vld [vmem:[%s2497_s9 + $0x84] ss:$28 sps:$4 sm:$0xff]  }
 0x1f8   :  { %v1931_v45 = vld [vmem:[%s2497_s9 + $0x88] ss:$28 sps:$4 sm:$0xff]   ;;  %v1932_v47 = vld [vmem:[%s2497_s9 + $0xb8] ss:$28 sps:$4 sm:$0xff]  }
 0x1f9   :  { %v731_v48 = vpack.c.bf16 %v730_v46, %v730_v46  ;;  %v1934_v46 = vld [vmem:[%s2497_s9 + $0xbc] ss:$28 sps:$4 sm:$0xff]  }
 0x1fb   :  { %1768 = vmatmul.mubr.msk.bf16.vlgmr.msra.gmra.mrb[8].mxu0 %vm771_vm2, %v731_v48  ;;  %v1935_v48 = vld [vmem:[%s2497_s9 + $0xc0] ss:$28 sps:$4 sm:$0xff]  }
 0x1fc   :  { %1291 = vmatpush1.bf16.msra.mxu0 %v1872_v51  ;;  %1322 = vmatprep.mubr.bf16.mxu0 %v1978_v28  ;;  %v1939_v51 = vld [vmem:[%s2497_s9 + $0xf8] ss:$28 sps:$4 sm:$0xff]  }
 0x1fd   :  { %1292 = vmatprep.subr.bf16.mxu0 %v1880_v54  ;;  %v1943_v54 = vld [vmem:[%s2497_s9 + $0x130] ss:$28 sps:$4 sm:$0xff]  }
 0x200   :  { %1293 = vmatpush1.bf16.msra.mxu0 %v1878_v55  ;;  %v1946_v55 = vld [vmem:[%s2497_s9 + $0x164] ss:$28 sps:$4 sm:$0xff]  }
 0x201   :  { %1294 = vmatprep.subr.bf16.mxu0 %v1886_v56  ;;  %v1944_v56 = vld [vmem:[%s2497_s9 + $0x160] ss:$28 sps:$4 sm:$0xff]  }
 0x204   :  { %1295 = vmatpush1.bf16.msra.mxu0 %v1884_v57  ;;  %v1947_v57 = vld [vmem:[%s2497_s9 + $0x168] ss:$28 sps:$4 sm:$0xff]  }
 0x205   :  { %1296 = vmatprep.subr.bf16.mxu0 %v1892_v58  ;;  %v1950_v58 = vld [vmem:[%s2497_s9 + $0x19c] ss:$28 sps:$4 sm:$0xff]  }
 0x208   :  { %1297 = vmatpush1.bf16.msra.mxu0 %v1890_v59  ;;  %v1948_v59 = vld [vmem:[%s2497_s9 + $0x198] ss:$28 sps:$4 sm:$0xff]  }
 0x209   :  { %1298 = vmatprep.subr.bf16.mxu0 %v1898_v60  ;;  %v1951_v60 = vld [vmem:[%s2497_s9 + $0x1a0] ss:$28 sps:$4 sm:$0xff]   ;;  %s1979_s9 = smov [#allocation2]  }
 0x20c   :  { %1299 = vmatpush1.bf16.msra.mxu0 %v1896_v61  ;;  %v967_v61 = vlaneseq }
 0x20d   :  { %1300 = vmatprep.subr.bf16.mxu0 %v1904_v62 }
 0x20e   :  { %v968_v62 = vshrl.u32 %v967_v61, 7 }
 0x210   :  { %1301 = vmatpush1.bf16.msra.mxu0 %v1902_v63  ;;  %v969_v63 = vsub.s32 0, %v968_v62 }
 0x211   :  { %1302 = vmatprep.subr.bf16.mxu0 %v1910_v0  ;;  %v977_v0 = vsub.s32 2, %v968_v62 }
 0x214   :  { %1303 = vmatpush1.bf16.msra.mxu0 %v1908_v1  ;;  %v965_v1 = vld [vmem:[%s2498_s10] sm:$0x7f]  ;;  %s1493_s10 = sshll.u32 %s1979_s9, 4  ;;  %s1494_s10 = int_to_ptr.vmem [resolvable:$true] %s1493_s10 }
 0x215   :  { %1304 = vmatprep.subr.bf16.mxu0 %v1916_v23  ;;  %v989_v23 = vsub.s32 5, %v968_v62  ;;  %s1952_s13 = scalar_lea.vmem %s1494_s10, 448  ;;  %p1957_p1 = scmp.lt.s32.totalorder %s1494_s10, %s1494_s10 }
 0x216   :  { %p1953_p0 = scmp.ne.s32.totalorder %s1494_s10, %s1952_s13  ;;  %p1958_p2 = scmp.lt.s32.totalorder %s1952_s13, %s1952_s13 }
 0x218   :  { %1305 = vmatpush1.bf16.msra.mxu0 %v1914_v25  ;;  %p1959_p3 = por %p1958_p2, %p1957_p1 }
 0x219   :  { %1372 = vmatprep.subr.bf16.mxu0 %v1922_v27 }
 0x21a   :  { %p1960_p4 = pnand %p1959_p3, %p1953_p0 }
 0x2ce   :  { %v809_v3 = vpop.f32.mrb[8].mxu0 }
 0x2cf   :  { %v810_v4 = vadd.f32 %v1561_v2, %v809_v3  ;;  %v1769_v5 = vpop.f32.mrb[9].mxu0  ;;  %v973_v2 = vsub.s32 1, %v968_v62  ;;  %v981_v3 = vsub.s32 3, %v968_v62 }
 0x2d0   :  { %v812_v6 = vpop.f32.mrb[10].mxu0  ;;  %v978_v5 = vrot.slane %v965_v1, %v977_v0 }
 0x2d1   :  { %v815_v7 = vmax.f32 %v810_v4, 0.0  ;;  %v1770_v8 = vpop.f32.mrb[11].mxu0  ;;  %v970_v4 = vrot.slane %v965_v1, %v969_v63  ;;  %v974_v6 = vrot.slane %v965_v1, %v973_v2 }
 0x2d3   :  { %v816_v10 = vpack.c.bf16 %v815_v7, %v815_v7  ;;  %v982_v7 = vrot.slane %v965_v1, %v981_v3 }
 0x2d5   :  { %1780 = vmatmul.mubr.msk.bf16.vlgmr.msra.gmra.mrb[12].mxu1 %vm771_vm2, %v816_v10 }
 0x2d6   :  { %1332 = vmatpush1.bf16.msra.mxu1 %v1875_v9  ;;  %1363 = vmatprep.mubr.bf16.mxu1 %v1978_v28 }
 0x2d7   :  { %1333 = vmatprep.subr.bf16.mxu1 %v1883_v11 }
 0x2da   :  { %1334 = vmatpush1.bf16.msra.mxu1 %v1881_v12 }
 0x2db   :  { %1335 = vmatprep.subr.bf16.mxu1 %v1889_v13 }
 0x2de   :  { %1336 = vmatpush1.bf16.msra.mxu1 %v1887_v14 }
 0x2df   :  { %1337 = vmatprep.subr.bf16.mxu1 %v1895_v15 }
 0x2e2   :  { %1338 = vmatpush1.bf16.msra.mxu1 %v1893_v16 }
 0x2e3   :  { %1339 = vmatprep.subr.bf16.mxu1 %v1901_v17 }
 0x2e6   :  { %1340 = vmatpush1.bf16.msra.mxu1 %v1899_v18 }
 0x2e7   :  { %1341 = vmatprep.subr.bf16.mxu1 %v1907_v19 }
 0x2ea   :  { %1342 = vmatpush1.bf16.msra.mxu1 %v1905_v20 }
 0x2eb   :  { %1343 = vmatprep.subr.bf16.mxu1 %v1913_v21  ;;  %v985_v21 = vsub.s32 4, %v968_v62 }
 0x2ee   :  { %1344 = vmatpush1.bf16.msra.mxu1 %v1911_v22  ;;  %v993_v22 = vsub.s32 6, %v968_v62 }
 0x2ef   :  { %1345 = vmatprep.subr.bf16.mxu1 %v1919_v24  ;;  %v986_v24 = vrot.slane %v965_v1, %v985_v21 }
 0x2f0   :  { %v994_v25 = vrot.slane %v965_v1, %v993_v22 }
 0x2f2   :  { %1346 = vmatpush1.bf16.msra.mxu1 %v1917_v26  ;;  %v990_v26 = vrot.slane %v965_v1, %v989_v23 }
 0x2f3   :  { %1783 = vmatprep.subr.bf16.mxu1 %v1976_v44 }
 0x3a8   :  { %v893_v30 = vpop.f32.mrb[12].mxu1 }
 0x3a9   :  { %v894_v31 = vadd.f32 %v1567_v29, %v893_v30  ;;  %v1781_v32 = vpop.f32.mrb[13].mxu1 }
 0x3aa   :  { %v896_v33 = vpop.f32.mrb[14].mxu1 }
 0x3ab   :  { %v899_v34 = vmax.f32 %v894_v31, 0.0  ;;  %v1782_v35 = vpop.f32.mrb[15].mxu1 }
 0x3ad   :  { %v900_v38 = vpack.c.bf16 %v899_v34, %v899_v34 }
 0x3af   :  { %1323 = vmatmul.mubr.bf16.vlgmr.msra.gmra.mrb[12].mxu0 %v900_v38  ;;  %1364 = vmatmul.mubr.bf16.vlgmr.msra.gmra.mrb[16].mxu1 %v900_v38 }
 0x3b0   :  { %1373 = vmatpush1.bf16.msra.mxu0 %v1920_v36  ;;  %1784 = vmatpush3.bf16.msra.mxu1 %v1923_v37 }
 0x3b1   :  { %1374 = vmatprep.subr.bf16.mxu0 %v1926_v39  ;;  %1785 = vmatprep.subr.bf16.mxu1 %v1976_v44 }
 0x3b2   :  { %1404 = vmatprep.mubr.bf16.mxu0 %v1978_v28  ;;  %1799 = vmatprep.mubr.msk.bf16.mxu1 %vm1977_vm0, %v1976_v44 }
 0x3b4   :  { %1375 = vmatpush1.bf16.msra.mxu0 %v1924_v40  ;;  %1786 = vmatpush3.bf16.msra.mxu1 %v1927_v41 }
 0x3b5   :  { %1376 = vmatprep.subr.bf16.mxu0 %v1930_v42  ;;  %1787 = vmatprep.subr.bf16.mxu1 %v1976_v44 }
 0x3b8   :  { %1377 = vmatpush1.bf16.msra.mxu0 %v1928_v43  ;;  %1788 = vmatpush3.bf16.msra.mxu1 %v1931_v45 }
 0x3b9   :  { %1378 = vmatprep.subr.bf16.mxu0 %v1934_v46  ;;  %1789 = vmatprep.subr.bf16.mxu1 %v1976_v44 }
 0x3bc   :  { %1379 = vmatpush1.bf16.msra.mxu0 %v1932_v47  ;;  %1790 = vmatpush3.bf16.msra.mxu1 %v1935_v48 }
 0x3bd   :  { %1380 = vmatprep.subr.bf16.mxu0 %v1938_v49  ;;  %1791 = vmatprep.subr.bf16.mxu1 %v1976_v44 }
 0x3c0   :  { %1381 = vmatpush1.bf16.msra.mxu0 %v1936_v50  ;;  %1792 = vmatpush3.bf16.msra.mxu1 %v1939_v51 }
 0x3c1   :  { %1382 = vmatprep.subr.bf16.mxu0 %v1942_v52  ;;  %1793 = vmatprep.subr.bf16.mxu1 %v1976_v44 }
 0x3c4   :  { %1383 = vmatpush1.bf16.msra.mxu0 %v1940_v53  ;;  %1794 = vmatpush3.bf16.msra.mxu1 %v1943_v54 }
 0x3c5   :  { %1384 = vmatprep.subr.bf16.mxu0 %v1946_v55  ;;  %1795 = vmatprep.subr.bf16.mxu1 %v1976_v44 }
 0x3c8   :  { %1385 = vmatpush1.bf16.msra.mxu0 %v1944_v56  ;;  %1796 = vmatpush3.bf16.msra.mxu1 %v1947_v57 }
 0x3c9   :  { %1386 = vmatprep.subr.bf16.mxu0 %v1950_v58  ;;  %1797 = vmatprep.subr.bf16.mxu1 %v1976_v44 }
 0x3cc   :  { %1387 = vmatpush1.bf16.msra.mxu0 %v1948_v59  ;;  %1798 = vmatpush3.bf16.msra.mxu1 %v1951_v60 }
 0x3cf   :  { %1405 = vmatmul.mubr.bf16.vlgmr.msra.gmra.mrb[16].mxu0 %v900_v38  ;;  %1800 = vmatmul.mubr.bf16.vlgmr.msra.gmra.mrb[20].mxu1 %v900_v38 }
 0x482   :  { %v1324_v8 = vpop.f32.mrb[12].mxu0  ;;  %v1365_v44 = vpop.f32.mrb[16].mxu1 }
 0x483   :  { %v1325_v9 = vadd.f32 %v1324_v8, %v970_v4  ;;  %v1366_v10 = vadd.f32 %v1365_v44, %v978_v5  ;;  %v1326_v11 = vpop.f32.mrb[13].mxu0  ;;  %v1367_v12 = vpop.f32.mrb[17].mxu1 }
 0x484   :  { %v1327_v13 = vadd.f32 %v1326_v11, %v974_v6  ;;  %v1368_v14 = vadd.f32 %v1367_v12, %v982_v7  ;;  %v1328_v15 = vpop.f32.mrb[14].mxu0  ;;  %v1369_v16 = vpop.f32.mrb[18].mxu1 }
 0x485   :  { %v1329_v17 = vpop.f32.mrb[15].mxu0  ;;  %v1370_v18 = vpop.f32.mrb[19].mxu1 }
 0x486   :  { %v1633_v19 = vpack.c.bf16 %v1327_v13, %v1325_v9  ;;  %v1634_v20 = vpack.c.bf16 %v1368_v14, %v1366_v10 }
 0x488   :  { %1482 = vst [vmem:[#allocation2] sm:$0xff] %v1633_v19  ;;  %1483 = vst [vmem:[#allocation2 + $0x8] sm:$0xff] %v1634_v20 }
 0x4a2   :  { %v1406_v27 = vpop.f32.mrb[16].mxu0  ;;  %v1447_v28 = vpop.f32.mrb[20].mxu1 }
 0x4a3   :  { %v1407_v29 = vadd.f32 %v1406_v27, %v986_v24  ;;  %v1448_v30 = vadd.f32 %v1447_v28, %v994_v25  ;;  %v1408_v31 = vpop.f32.mrb[17].mxu0  ;;  %v1801_v32 = vpop.f32.mrb[21].mxu1 }
 0x4a4   :  { %v1409_v33 = vadd.f32 %v1408_v31, %v990_v26  ;;  %v1410_v34 = vpop.f32.mrb[18].mxu0  ;;  %v1450_v35 = vpop.f32.mrb[22].mxu1 }
 0x4a5   :  { %v1636_v36 = vpack.c.bf16 %v1448_v30, %v1448_v30  ;;  %v1411_v37 = vpop.f32.mrb[19].mxu0  ;;  %v1802_v38 = vpop.f32.mrb[23].mxu1 }
 0x4a6   :  { %v1635_v39 = vpack.c.bf16 %v1409_v33, %v1407_v29 }
 0x4a7   :  { %1486 = vst.msk [vmem:[#allocation2 + $0x18] sm:$0xf] %vm1485_vm3, %v1636_v36 }
 0x4a8   :  { %1484 = vst [vmem:[#allocation2 + $0x10] sm:$0xff] %v1635_v39 }
 0x4a9   :  { %1963 = shalt.err (!%p1960_p4)
}
 0x4aa   :  { %s1964_s3 = scalar_lea.hbm %s2499_s11, 448 }
 0x4ab   :  { %p1965_p5 = scmp.ne.s32.totalorder %s2499_s11, %s1964_s3  ;;  %p1968_p6 = scmp.lt.u32.totalorder %s1964_s3, %s2499_s11 }
 0x4ad   :  { %p1970_p7 = pnand %p1968_p6, %p1965_p5 }
 0x4af   :  { %1973 = shalt.err (!%p1970_p7)
}
 0x4b0   :  { %1496 = dma.vmem_to_hbm [thread:$0]  %s1494_s10, 448, %s2499_s11, [#allocation3]  }
 0x4b1   :  { %1974 = dma.done.wait [#allocation3], 448  }
 0x4b2   :  { %1975 = vsyncadd [#allocation3], 4294966848 }
 0x4b3   :  { %1500 = vsyncpa [#allocation3], 1 }

</bundles_post_ra>
